<compile_context>
chip_gen: v7x
topology: tpu7x:2x2x1
jax: 0.10.0
libtpu: 0.0.40
codegen_flags: <defaults>
</compile_context>

<pallas_src>
import functools

import jax
import jax.numpy as jnp
from jax.experimental import pallas as pl
from jax.experimental.pallas import tpu as pltpu

BN_EPS = 1e-5
LANE = 128


def _round_up(x, m):
    return (x + m - 1) // m * m


def _pad2d(a, rows, cols):
    r, c = a.shape
    if r == rows and c == cols:
        return a
    return jnp.pad(a, ((0, rows - r), (0, cols - c)))


# ----------------------------------------------------------------------------
# Pallas kernel: K-tiled GEMM (bf16 x bf16 -> f32 accumulator scratch), epilogue:
#   * bn_scale + bn_bias  [+ fused 1x1-conv shortcut (+BN)  |  + residual]  [ReLU]
# ----------------------------------------------------------------------------
def _conv_bn_kernel(*refs, mode, apply_relu):
    if mode == "shortcut":
        (p_ref, w_ref, s_ref, b_ref,
         xsc_ref, wsc_ref, ssc_ref, bsc_ref, o_ref, acc_ref) = refs
    elif mode == "residual":
        p_ref, w_ref, s_ref, b_ref, r_ref, o_ref, acc_ref = refs
    else:
        p_ref, w_ref, s_ref, b_ref, o_ref, acc_ref = refs

    @pl.when(pl.program_id(1) == 0)
    def _():
        acc_ref[...] = jnp.zeros_like(acc_ref)

    acc_ref[...] += jnp.dot(p_ref[...], w_ref[...],
                            preferred_element_type=jnp.float32)

    @pl.when(pl.program_id(1) == pl.num_programs(1) - 1)
    def _():
        acc = acc_ref[...] * s_ref[...] + b_ref[...]        # folded BatchNorm
        if mode == "shortcut":
            sc = jnp.dot(xsc_ref[...], wsc_ref[...],
                         preferred_element_type=jnp.float32)
            acc = acc + (sc * ssc_ref[...] + bsc_ref[...])  # fused 1x1 conv + BN shortcut
        elif mode == "residual":
            acc = acc + r_ref[...].astype(jnp.float32)      # identity shortcut
        if apply_relu:
            acc = jnp.maximum(acc, 0.0)
        o_ref[...] = acc.astype(o_ref.dtype)


def conv_bn_pallas(patches, w_gemm, bn_scale, bn_bias, *,
                   shortcut=None, residual=None, relu=False,
                   out_dtype=jnp.float32):
    """patches: (M, K); w_gemm: (K, Cout); bn_*: (Cout,).
       shortcut: optional (x_sc (M, Ksc), w_sc (Ksc, Cout), sc_scale, sc_bias).
       residual: optional (M, Cout) added before the final ReLU."""
    M, K = patches.shape
    Cout = w_gemm.shape[1]
    Cp = _round_up(Cout, LANE)                  # lane-dense output columns

    # ---- M tiling: big tiles, padded M, >=2 grid steps when possible (megacore) ----
    tm = 512
    while tm > 128 and pl.cdiv(M, tm) < 2:
        tm //= 2
    Mp = _round_up(M, tm)

    # ---- K tiling: single full-K block if small, else lane-aligned reduction tiles ----
    if K <= LANE:
        Kp, tk = K, K
    else:
        Kp = _round_up(K, LANE)
        tk = LANE
        for cand in (512, 384, 256, 128):
            if Kp % cand == 0:
                tk = cand
                break
    num_k = Kp // tk

    patches_p = _pad2d(patches.astype(jnp.bfloat16), Mp, Kp)
    w_p = _pad2d(w_gemm.astype(jnp.bfloat16), Kp, Cp)
    s_p = _pad2d(bn_scale.reshape(1, Cout).astype(jnp.float32), 1, Cp)
    b_p = _pad2d(bn_bias.reshape(1, Cout).astype(jnp.float32), 1, Cp)

    in_specs = [
        pl.BlockSpec((tm, tk), lambda i, k: (i, k)),
        pl.BlockSpec((tk, Cp), lambda i, k: (k, 0)),
        pl.BlockSpec((1, Cp), lambda i, k: (0, 0)),
        pl.BlockSpec((1, Cp), lambda i, k: (0, 0)),
    ]
    args = [patches_p, w_p, s_p, b_p]
    aux_bytes = 0

    if shortcut is not None:
        x_sc, w_sc, sc_scale, sc_bias = shortcut
        Ksc = x_sc.shape[1]
        Kscp = _round_up(Ksc, 8)
        xsc_p = _pad2d(x_sc.astype(jnp.bfloat16), Mp, Kscp)
        wsc_p = _pad2d(w_sc.astype(jnp.bfloat16), Kscp, Cp)
        ssc_p = _pad2d(sc_scale.reshape(1, Cout).astype(jnp.float32), 1, Cp)
        bsc_p = _pad2d(sc_bias.reshape(1, Cout).astype(jnp.float32), 1, Cp)
        in_specs += [
            pl.BlockSpec((tm, Kscp), lambda i, k: (i, 0)),
            pl.BlockSpec((Kscp, Cp), lambda i, k: (0, 0)),
            pl.BlockSpec((1, Cp), lambda i, k: (0, 0)),
            pl.BlockSpec((1, Cp), lambda i, k: (0, 0)),
        ]
        args += [xsc_p, wsc_p, ssc_p, bsc_p]
        mode = "shortcut"
        aux_bytes = 2 * (tm * Kscp * 2 + Kscp * Cp * 2 + 2 * Cp * 4)
    elif residual is not None:
        res_p = _pad2d(residual.astype(jnp.float32), Mp, Cp)
        in_specs.append(pl.BlockSpec((tm, Cp), lambda i, k: (i, 0)))
        args.append(res_p)
        mode = "residual"
        aux_bytes = 2 * tm * Cp * 4
    else:
        mode = "plain"

    kernel = functools.partial(_conv_bn_kernel, mode=mode, apply_relu=relu)

    # Explicit VMEM budget: double-buffered inputs/outputs + f32 accumulator (+ margin).
    vmem_bytes = (2 * (tm * tk * 2 + tk * Cp * 2)   # patches + weights (bf16, x2 buffers)
                  + 2 * tm * Cp * 4                 # output blocks (<= f32, x2 buffers)
                  + tm * Cp * 4                     # accumulator scratch
                  + aux_bytes + 4 * Cp * 4)
    vmem_limit = int(min(max(2 * vmem_bytes, 32 * 2**20), 64 * 2**20))

    out = pl.pallas_call(
        kernel,
        out_shape=jax.ShapeDtypeStruct((Mp, Cp), out_dtype),
        grid=(Mp // tm, num_k),
        in_specs=in_specs,
        out_specs=pl.BlockSpec((tm, Cp), lambda i, k: (i, 0)),
        scratch_shapes=[pltpu.VMEM((tm, Cp), jnp.float32)],
        compiler_params=pltpu.CompilerParams(
            dimension_semantics=("parallel", "arbitrary"),
            vmem_limit_bytes=vmem_limit),
    )(*args)
    return out[:M, :Cout]


# ----------------------------------------------------------------------------
# Plain-JAX glue: im2col (bf16 patches), weight reshaping, BN folding
# ----------------------------------------------------------------------------
def im2col(x_nhwc, kh, kw, stride, dilation, pad):
    N, H, W, C = x_nhwc.shape
    xp = jnp.pad(x_nhwc, ((0, 0), (pad, pad), (pad, pad), (0, 0)))
    Ho = (H + 2 * pad - dilation * (kh - 1) - 1) // stride + 1
    Wo = (W + 2 * pad - dilation * (kw - 1) - 1) // stride + 1
    cols = []
    for i in range(kh):
        for j in range(kw):
            sl = xp[:, i * dilation: i * dilation + (Ho - 1) * stride + 1: stride,
                       j * dilation: j * dilation + (Wo - 1) * stride + 1: stride, :]
            cols.append(sl)
    patches = jnp.concatenate(cols, axis=-1)                  # (N, Ho, Wo, kh*kw*C)
    return patches.reshape(N * Ho * Wo, kh * kw * C), Ho, Wo


def conv_weight_to_gemm(w_oihw):
    # PyTorch conv weight (Cout, Cin, KH, KW) -> (KH*KW*Cin, Cout), matching im2col order.
    Cout, Cin, KH, KW = w_oihw.shape
    return jnp.transpose(w_oihw, (2, 3, 1, 0)).reshape(KH * KW * Cin, Cout)


def fold_bn(gamma, beta, mean, var, eps=BN_EPS):
    scale = gamma / jnp.sqrt(var + eps)
    bias = beta - mean * scale
    return scale, bias


# ----------------------------------------------------------------------------
# ResidualBlock forward (stride=1 supported in-kernel; shortcut fused into conv2 call)
# ----------------------------------------------------------------------------
def residual_block_forward(x_nchw, params, stride=1, dilation=1):
    assert stride == 1, "stride > 1 not implemented"   # TODO(synk): strided conv in-kernel
    x = jnp.transpose(x_nchw, (0, 2, 3, 1)).astype(jnp.float32)   # NCHW -> NHWC
    N, H, W, Cin = x.shape
    Cout = params["conv1_w"].shape[0]
    x_bf = x.astype(jnp.bfloat16)                                  # bf16 GEMM operands

    # conv1 -> bn1 -> relu (intermediate emitted in bf16; it feeds a bf16 GEMM anyway)
    p1, Ho, Wo = im2col(x_bf, 3, 3, stride, dilation, dilation)
    s1, b1 = fold_bn(*params["bn1"])
    out1 = conv_bn_pallas(p1, conv_weight_to_gemm(params["conv1_w"]), s1, b1,
                          relu=True, out_dtype=jnp.bfloat16)
    out1_nhwc = out1.reshape(N, Ho, Wo, Cout)

    # conv2 -> bn2 -> (+shortcut) -> relu, all in one fused kernel call
    p2, _, _ = im2col(out1_nhwc, 3, 3, 1, dilation, dilation)
    s2, b2 = fold_bn(*params["bn2"])
    w2 = conv_weight_to_gemm(params["conv2_w"])
    if stride != 1 or Cin != Cout:
        ss, bs = fold_bn(*params["bn_sc"])
        shortcut = (x_bf.reshape(N * H * W, Cin),
                    conv_weight_to_gemm(params["sc_w"]), ss, bs)
        out = conv_bn_pallas(p2, w2, s2, b2, shortcut=shortcut, relu=True,
                             out_dtype=jnp.float32)
    else:
        out = conv_bn_pallas(p2, w2, s2, b2, residual=x.reshape(N * Ho * Wo, Cout),
                             relu=True, out_dtype=jnp.float32)
    return jnp.transpose(out.reshape(N, Ho, Wo, Cout), (0, 3, 1, 2))   # back to NCHW


# ----------------------------------------------------------------------------
# Pure-JAX reference (mixed=True mirrors the bf16-operand / f32-accumulate policy)
# ----------------------------------------------------------------------------
def _ref_conv(x_nhwc, w_oihw, stride, dilation, pad):
    return jax.lax.conv_general_dilated(
        x_nhwc, w_oihw, window_strides=(stride, stride),
        padding=((pad, pad), (pad, pad)), rhs_dilation=(dilation, dilation),
        dimension_numbers=("NHWC", "OIHW", "NHWC"),
        preferred_element_type=jnp.float32)


def residual_block_ref(x_nchw, params, stride=1, dilation=1, mixed=False):
    cast = ((lambda a: a.astype(jnp.bfloat16).astype(jnp.float32)) if mixed
            else (lambda a: a))
    x = jnp.transpose(x_nchw, (0, 2, 3, 1)).astype(jnp.float32)
    Cin = x.shape[-1]
    Cout = params["conv1_w"].shape[0]
    s1, b1 = fold_bn(*params["bn1"])
    out = jax.nn.relu(_ref_conv(cast(x), cast(params["conv1_w"]),
                                stride, dilation, dilation) * s1 + b1)
    out = cast(out)
    s2, b2 = fold_bn(*params["bn2"])
    out = _ref_conv(out, cast(params["conv2_w"]), 1, dilation, dilation) * s2 + b2
    if stride != 1 or Cin != Cout:
        ss, bs = fold_bn(*params["bn_sc"])
        sc = _ref_conv(cast(x), cast(params["sc_w"]), stride, 1, 0) * ss + bs
    else:
        sc = x
    out = jax.nn.relu(out + sc)
    return jnp.transpose(out, (0, 3, 1, 2))


# ----------------------------------------------------------------------------
def init_params(key, in_channels, out_channels):
    ks = jax.random.split(key, 12)

    def bn(k0, k1, k2, k3, c):
        gamma = jax.random.uniform(k0, (c,), jnp.float32, 0.5, 1.5)
        beta = 0.1 * jax.random.normal(k1, (c,), jnp.float32)
        mean = 0.1 * jax.random.normal(k2, (c,), jnp.float32)
        var = jax.random.uniform(k3, (c,), jnp.float32, 0.5, 1.5)
        return gamma, beta, mean, var

    return {
        "conv1_w": 0.2 * jax.random.normal(ks[0], (out_channels, in_channels, 3, 3), jnp.float32),
        "conv2_w": 0.2 * jax.random.normal(ks[1], (out_channels, out_channels, 3, 3), jnp.float32),
        "sc_w":    0.2 * jax.random.normal(ks[2], (out_channels, in_channels, 1, 1), jnp.float32),
        "bn1": bn(ks[3], ks[4], ks[5], ks[6], out_channels),
        "bn2": bn(ks[7], ks[8], ks[9], ks[10], out_channels),
        "bn_sc": bn(*jax.random.split(ks[11], 4), out_channels),
    }


if __name__ == "__main__":
    key = jax.random.PRNGKey(0)
    k_x, k_p = jax.random.split(key)

    N, Cin, Cout, H, W = 2, 4, 8, 16, 16        # in != out -> fused 1x1 shortcut exercised
    x = jax.random.normal(k_x, (N, Cin, H, W), jnp.float32)   # PyTorch-style NCHW input
    params = init_params(k_p, Cin, Cout)

    fwd = jax.jit(functools.partial(residual_block_forward, stride=1, dilation=1))
    out = jax.block_until_ready(fwd(x, params))
    assert out.shape == (N, Cout, H, W), out.shape

    # Tight check vs. a reference using the same bf16-operand / f32-accumulate policy.
    ref_mixed = jax.block_until_ready(residual_block_ref(x, params, mixed=True))
    err_mixed = float(jnp.max(jnp.abs(out - ref_mixed)))
    assert jnp.allclose(out, ref_mixed, rtol=1e-2, atol=1e-2), err_mixed

    # Sanity check vs. the pure-f32 module semantics (bf16 MXU-operand tolerance).
    ref_f32 = jax.block_until_ready(residual_block_ref(x, params, mixed=False))
    err_f32 = float(jnp.max(jnp.abs(out - ref_f32)))
    assert jnp.allclose(out, ref_f32, rtol=1e-1, atol=2e-1), err_f32

    print("KERNEL_OK")
</pallas_src>

<mosaic_0001>
module attributes {stable_mosaic.version = 11 : i64} {
  func.func @_conv_bn_kernel(%arg0: i32, %arg1: i32, %arg2: memref<256x36xbf16, #tpu.memory_space<vmem>>, %arg3: memref<36x128xbf16, #tpu.memory_space<vmem>>, %arg4: memref<1x128xf32, #tpu.memory_space<vmem>>, %arg5: memref<1x128xf32, #tpu.memory_space<vmem>>, %arg6: memref<256x128xbf16, #tpu.memory_space<vmem>>, %arg7: memref<256x128xf32, #tpu.memory_space<vmem>>) attributes {dimension_semantics = [#tpu.dimension_semantics<parallel>, #tpu.dimension_semantics<arbitrary>], iteration_bounds = array<i64: 2, 1>, scalar_prefetch = 0 : i64, scratch_operands = 1 : i64, tpu.core_type = #tpu.core_type<tc>, window_params = [{transform_indices = @transform_0, window_bounds = array<i64: 256, 36>}, {transform_indices = @transform_1, window_bounds = array<i64: 36, 128>}, {pipeline_mode = #tpu.pipeline_mode<synchronous>, transform_indices = @transform_2, window_bounds = array<i64: 1, 128>}, {pipeline_mode = #tpu.pipeline_mode<synchronous>, transform_indices = @transform_3, window_bounds = array<i64: 1, 128>}, {transform_indices = @transform_4, window_bounds = array<i64: 256, 128>}]} {
    %c0_i32 = arith.constant 0 : i32
    %0 = arith.cmpi eq, %arg1, %c0_i32 : i32
    %1 = arith.extui %0 : i1 to i32
    %c0_i32_0 = arith.constant 0 : i32
    %2 = arith.cmpi ne, %1, %c0_i32_0 : i32
    scf.if %2 {
      %cst_10 = arith.constant 0.000000e+00 : f32
      %12 = vector.broadcast %cst_10 : f32 to vector<256x128xf32>
      %c0_11 = arith.constant 0 : index
      %c0_12 = arith.constant 0 : index
      %13 = vector.load %arg7[%c0_11, %c0_12] : memref<256x128xf32, #tpu.memory_space<vmem>>, vector<256x128xf32>
      tpu.vector_store %arg7[%c0_11, %c0_12], %12 {strides = array<i32>} : memref<256x128xf32, #tpu.memory_space<vmem>>, vector<256x128xf32>,
    } else {
    }
    %c0 = arith.constant 0 : index
    %c0_1 = arith.constant 0 : index
    %3 = vector.load %arg7[%c0, %c0_1] : memref<256x128xf32, #tpu.memory_space<vmem>>, vector<256x128xf32>
    %c0_2 = arith.constant 0 : index
    %c0_3 = arith.constant 0 : index
    %4 = vector.load %arg2[%c0_2, %c0_3] : memref<256x36xbf16, #tpu.memory_space<vmem>>, vector<256x36xbf16>
    %c0_4 = arith.constant 0 : index
    %c0_5 = arith.constant 0 : index
    %5 = vector.load %arg3[%c0_4, %c0_5] : memref<36x128xbf16, #tpu.memory_space<vmem>>, vector<36x128xbf16>
    %cst = arith.constant dense<0.000000e+00> : vector<256x128xf32>
    %6 = tpu.matmul %4, %5, %cst {dimension_numbers = #tpu.dot_dimension_numbers<[1], [0], [0], [1], [0, 0, 1, 1], [], []>} : vector<256x36xbf16>, vector<36x128xbf16>, vector<256x128xf32> -> vector<256x128xf32>
    %7 = arith.addf %3, %6 : vector<256x128xf32>
    %c0_6 = arith.constant 0 : index
    %c0_7 = arith.constant 0 : index
    %8 = vector.load %arg7[%c0_6, %c0_7] : memref<256x128xf32, #tpu.memory_space<vmem>>, vector<256x128xf32>
    tpu.vector_store %arg7[%c0_6, %c0_7], %7 {strides = array<i32>} : memref<256x128xf32, #tpu.memory_space<vmem>>, vector<256x128xf32>,
    %c0_i32_8 = arith.constant 0 : i32
    %9 = arith.cmpi eq, %arg1, %c0_i32_8 : i32
    %10 = arith.extui %9 : i1 to i32
    %c0_i32_9 = arith.constant 0 : i32
    %11 = arith.cmpi ne, %10, %c0_i32_9 : i32
    scf.if %11 {
      %c0_10 = arith.constant 0 : index
      %c0_11 = arith.constant 0 : index
      %12 = vector.load %arg7[%c0_10, %c0_11] : memref<256x128xf32, #tpu.memory_space<vmem>>, vector<256x128xf32>
      %c0_12 = arith.constant 0 : index
      %c0_13 = arith.constant 0 : index
      %13 = vector.load %arg4[%c0_12, %c0_13] : memref<1x128xf32, #tpu.memory_space<vmem>>, vector<1x128xf32>
      %14 = vector.broadcast %13 : vector<1x128xf32> to vector<256x128xf32>
      %15 = arith.mulf %12, %14 : vector<256x128xf32>
      %c0_14 = arith.constant 0 : index
      %c0_15 = arith.constant 0 : index
      %16 = vector.load %arg5[%c0_14, %c0_15] : memref<1x128xf32, #tpu.memory_space<vmem>>, vector<1x128xf32>
      %17 = vector.broadcast %16 : vector<1x128xf32> to vector<256x128xf32>
      %18 = arith.addf %15, %17 : vector<256x128xf32>
      %cst_16 = arith.constant 0.000000e+00 : f32
      %19 = vector.broadcast %cst_16 : f32 to vector<256x128xf32>
      %20 = arith.maximumf %18, %19 : vector<256x128xf32>
      %21 = arith.truncf %20 : vector<256x128xf32> to vector<256x128xbf16>
      %c0_17 = arith.constant 0 : index
      %c0_18 = arith.constant 0 : index
      %22 = vector.load %arg6[%c0_17, %c0_18] : memref<256x128xbf16, #tpu.memory_space<vmem>>, vector<256x128xbf16>
      tpu.vector_store %arg6[%c0_17, %c0_18], %21 {strides = array<i32>} : memref<256x128xbf16, #tpu.memory_space<vmem>>, vector<256x128xbf16>,
    } else {
    }
    return
  }
  func.func @transform_0(%arg0: i32, %arg1: i32) -> (i32, i32) {
    %c0_i32 = arith.constant 0 : i32
    return %arg0, %arg1 : i32, i32
  }
  func.func @transform_1(%arg0: i32, %arg1: i32) -> (i32, i32) {
    %c0_i32 = arith.constant 0 : i32
    %c0_i32_0 = arith.constant 0 : i32
    return %arg1, %c0_i32 : i32, i32
  }
  func.func @transform_2(%arg0: i32, %arg1: i32) -> (i32, i32) {
    %c0_i32 = arith.constant 0 : i32
    %c0_i32_0 = arith.constant 0 : i32
    %c0_i32_1 = arith.constant 0 : i32
    return %c0_i32, %c0_i32_0 : i32, i32
  }
  func.func @transform_3(%arg0: i32, %arg1: i32) -> (i32, i32) {
    %c0_i32 = arith.constant 0 : i32
    %c0_i32_0 = arith.constant 0 : i32
    %c0_i32_1 = arith.constant 0 : i32
    return %c0_i32, %c0_i32_0 : i32, i32
  }
  func.func @transform_4(%arg0: i32, %arg1: i32) -> (i32, i32) {
    %c0_i32 = arith.constant 0 : i32
    %c0_i32_0 = arith.constant 0 : i32
    return %arg0, %c0_i32 : i32, i32
  }
}

module attributes {stable_mosaic.version = 11 : i64} {
  func.func @_conv_bn_kernel(%arg0: i32, %arg1: i32, %arg2: memref<256x72xbf16, #tpu.memory_space<vmem>>, %arg3: memref<72x128xbf16, #tpu.memory_space<vmem>>, %arg4: memref<1x128xf32, #tpu.memory_space<vmem>>, %arg5: memref<1x128xf32, #tpu.memory_space<vmem>>, %arg6: memref<256x8xbf16, #tpu.memory_space<vmem>>, %arg7: memref<8x128xbf16, #tpu.memory_space<vmem>>, %arg8: memref<1x128xf32, #tpu.memory_space<vmem>>, %arg9: memref<1x128xf32, #tpu.memory_space<vmem>>, %arg10: memref<256x128xf32, #tpu.memory_space<vmem>>, %arg11: memref<256x128xf32, #tpu.memory_space<vmem>>) attributes {dimension_semantics = [#tpu.dimension_semantics<parallel>, #tpu.dimension_semantics<arbitrary>], iteration_bounds = array<i64: 2, 1>, scalar_prefetch = 0 : i64, scratch_operands = 1 : i64, tpu.core_type = #tpu.core_type<tc>, window_params = [{transform_indices = @transform_0, window_bounds = array<i64: 256, 72>}, {transform_indices = @transform_1, window_bounds = array<i64: 72, 128>}, {pipeline_mode = #tpu.pipeline_mode<synchronous>, transform_indices = @transform_2, window_bounds = array<i64: 1, 128>}, {pipeline_mode = #tpu.pipeline_mode<synchronous>, transform_indices = @transform_3, window_bounds = array<i64: 1, 128>}, {transform_indices = @transform_4, window_bounds = array<i64: 256, 8>}, {pipeline_mode = #tpu.pipeline_mode<synchronous>, transform_indices = @transform_5, window_bounds = array<i64: 8, 128>}, {pipeline_mode = #tpu.pipeline_mode<synchronous>, transform_indices = @transform_6, window_bounds = array<i64: 1, 128>}, {pipeline_mode = #tpu.pipeline_mode<synchronous>, transform_indices = @transform_7, window_bounds = array<i64: 1, 128>}, {transform_indices = @transform_8, window_bounds = array<i64: 256, 128>}]} {
    %c0_i32 = arith.constant 0 : i32
    %0 = arith.cmpi eq, %arg1, %c0_i32 : i32
    %1 = arith.extui %0 : i1 to i32
    %c0_i32_0 = arith.constant 0 : i32
    %2 = arith.cmpi ne, %1, %c0_i32_0 : i32
    scf.if %2 {
      %cst_10 = arith.constant 0.000000e+00 : f32
      %12 = vector.broadcast %cst_10 : f32 to vector<256x128xf32>
      %c0_11 = arith.constant 0 : index
      %c0_12 = arith.constant 0 : index
      %13 = vector.load %arg11[%c0_11, %c0_12] : memref<256x128xf32, #tpu.memory_space<vmem>>, vector<256x128xf32>
      tpu.vector_store %arg11[%c0_11, %c0_12], %12 {strides = array<i32>} : memref<256x128xf32, #tpu.memory_space<vmem>>, vector<256x128xf32>,
    } else {
    }
    %c0 = arith.constant 0 : index
    %c0_1 = arith.constant 0 : index
    %3 = vector.load %arg11[%c0, %c0_1] : memref<256x128xf32, #tpu.memory_space<vmem>>, vector<256x128xf32>
    %c0_2 = arith.constant 0 : index
    %c0_3 = arith.constant 0 : index
    %4 = vector.load %arg2[%c0_2, %c0_3] : memref<256x72xbf16, #tpu.memory_space<vmem>>, vector<256x72xbf16>
    %c0_4 = arith.constant 0 : index
    %c0_5 = arith.constant 0 : index
    %5 = vector.load %arg3[%c0_4, %c0_5] : memref<72x128xbf16, #tpu.memory_space<vmem>>, vector<72x128xbf16>
    %cst = arith.constant dense<0.000000e+00> : vector<256x128xf32>
    %6 = tpu.matmul %4, %5, %cst {dimension_numbers = #tpu.dot_dimension_numbers<[1], [0], [0], [1], [0, 0, 1, 1], [], []>} : vector<256x72xbf16>, vector<72x128xbf16>, vector<256x128xf32> -> vector<256x128xf32>
    %7 = arith.addf %3, %6 : vector<256x128xf32>
    %c0_6 = arith.constant 0 : index
    %c0_7 = arith.constant 0 : index
    %8 = vector.load %arg11[%c0_6, %c0_7] : memref<256x128xf32, #tpu.memory_space<vmem>>, vector<256x128xf32>
    tpu.vector_store %arg11[%c0_6, %c0_7], %7 {strides = array<i32>} : memref<256x128xf32, #tpu.memory_space<vmem>>, vector<256x128xf32>,
    %c0_i32_8 = arith.constant 0 : i32
    %9 = arith.cmpi eq, %arg1, %c0_i32_8 : i32
    %10 = arith.extui %9 : i1 to i32
    %c0_i32_9 = arith.constant 0 : i32
    %11 = arith.cmpi ne, %10, %c0_i32_9 : i32
    scf.if %11 {
      %c0_10 = arith.constant 0 : index
      %c0_11 = arith.constant 0 : index
      %12 = vector.load %arg11[%c0_10, %c0_11] : memref<256x128xf32, #tpu.memory_space<vmem>>, vector<256x128xf32>
      %c0_12 = arith.constant 0 : index
      %c0_13 = arith.constant 0 : index
      %13 = vector.load %arg4[%c0_12, %c0_13] : memref<1x128xf32, #tpu.memory_space<vmem>>, vector<1x128xf32>
      %14 = vector.broadcast %13 : vector<1x128xf32> to vector<256x128xf32>
      %15 = arith.mulf %12, %14 : vector<256x128xf32>
      %c0_14 = arith.constant 0 : index
      %c0_15 = arith.constant 0 : index
      %16 = vector.load %arg5[%c0_14, %c0_15] : memref<1x128xf32, #tpu.memory_space<vmem>>, vector<1x128xf32>
      %17 = vector.broadcast %16 : vector<1x128xf32> to vector<256x128xf32>
      %18 = arith.addf %15, %17 : vector<256x128xf32>
      %c0_16 = arith.constant 0 : index
      %c0_17 = arith.constant 0 : index
      %19 = vector.load %arg6[%c0_16, %c0_17] : memref<256x8xbf16, #tpu.memory_space<vmem>>, vector<256x8xbf16>
      %c0_18 = arith.constant 0 : index
      %c0_19 = arith.constant 0 : index
      %20 = vector.load %arg7[%c0_18, %c0_19] : memref<8x128xbf16, #tpu.memory_space<vmem>>, vector<8x128xbf16>
      %cst_20 = arith.constant dense<0.000000e+00> : vector<256x128xf32>
      %21 = tpu.matmul %19, %20, %cst_20 {dimension_numbers = #tpu.dot_dimension_numbers<[1], [0], [0], [1], [0, 0, 1, 1], [], []>} : vector<256x8xbf16>, vector<8x128xbf16>, vector<256x128xf32> -> vector<256x128xf32>
      %c0_21 = arith.constant 0 : index
      %c0_22 = arith.constant 0 : index
      %22 = vector.load %arg8[%c0_21, %c0_22] : memref<1x128xf32, #tpu.memory_space<vmem>>, vector<1x128xf32>
      %23 = vector.broadcast %22 : vector<1x128xf32> to vector<256x128xf32>
      %24 = arith.mulf %21, %23 : vector<256x128xf32>
      %c0_23 = arith.constant 0 : index
      %c0_24 = arith.constant 0 : index
      %25 = vector.load %arg9[%c0_23, %c0_24] : memref<1x128xf32, #tpu.memory_space<vmem>>, vector<1x128xf32>
      %26 = vector.broadcast %25 : vector<1x128xf32> to vector<256x128xf32>
      %27 = arith.addf %24, %26 : vector<256x128xf32>
      %28 = arith.addf %18, %27 : vector<256x128xf32>
      %cst_25 = arith.constant 0.000000e+00 : f32
      %29 = vector.broadcast %cst_25 : f32 to vector<256x128xf32>
      %30 = arith.maximumf %28, %29 : vector<256x128xf32>
      %c0_26 = arith.constant 0 : index
      %c0_27 = arith.constant 0 : index
      %31 = vector.load %arg10[%c0_26, %c0_27] : memref<256x128xf32, #tpu.memory_space<vmem>>, vector<256x128xf32>
      tpu.vector_store %arg10[%c0_26, %c0_27], %30 {strides = array<i32>} : memref<256x128xf32, #tpu.memory_space<vmem>>, vector<256x128xf32>,
    } else {
    }
    return
  }
  func.func @transform_0(%arg0: i32, %arg1: i32) -> (i32, i32) {
    %c0_i32 = arith.constant 0 : i32
    return %arg0, %arg1 : i32, i32
  }
  func.func @transform_1(%arg0: i32, %arg1: i32) -> (i32, i32) {
    %c0_i32 = arith.constant 0 : i32
    %c0_i32_0 = arith.constant 0 : i32
    return %arg1, %c0_i32 : i32, i32
  }
  func.func @transform_2(%arg0: i32, %arg1: i32) -> (i32, i32) {
    %c0_i32 = arith.constant 0 : i32
    %c0_i32_0 = arith.constant 0 : i32
    %c0_i32_1 = arith.constant 0 : i32
    return %c0_i32, %c0_i32_0 : i32, i32
  }
  func.func @transform_3(%arg0: i32, %arg1: i32) -> (i32, i32) {
    %c0_i32 = arith.constant 0 : i32
    %c0_i32_0 = arith.constant 0 : i32
    %c0_i32_1 = arith.constant 0 : i32
    return %c0_i32, %c0_i32_0 : i32, i32
  }
  func.func @transform_4(%arg0: i32, %arg1: i32) -> (i32, i32) {
    %c0_i32 = arith.constant 0 : i32
    %c0_i32_0 = arith.constant 0 : i32
    return %arg0, %c0_i32 : i32, i32
  }
  func.func @transform_5(%arg0: i32, %arg1: i32) -> (i32, i32) {
    %c0_i32 = arith.constant 0 : i32
    %c0_i32_0 = arith.constant 0 : i32
    %c0_i32_1 = arith.constant 0 : i32
    return %c0_i32, %c0_i32_0 : i32, i32
  }
  func.func @transform_6(%arg0: i32, %arg1: i32) -> (i32, i32) {
    %c0_i32 = arith.constant 0 : i32
    %c0_i32_0 = arith.constant 0 : i32
    %c0_i32_1 = arith.constant 0 : i32
    return %c0_i32, %c0_i32_0 : i32, i32
  }
  func.func @transform_7(%arg0: i32, %arg1: i32) -> (i32, i32) {
    %c0_i32 = arith.constant 0 : i32
    %c0_i32_0 = arith.constant 0 : i32
    %c0_i32_1 = arith.constant 0 : i32
    return %c0_i32, %c0_i32_0 : i32, i32
  }
  func.func @transform_8(%arg0: i32, %arg1: i32) -> (i32, i32) {
    %c0_i32 = arith.constant 0 : i32
    %c0_i32_0 = arith.constant 0 : i32
    return %arg0, %c0_i32 : i32, i32
  }
}

</mosaic_0001>

<bundles_post_ra>
// kernel: residual_block_forward.2
= control target key start
LH: loop header
LB: loop body
LE: loop exit
PB: predicated region body
PF: predicated region fallthrough
CT: control target
= control target key end

     0   :  { %s1478_s15 = smov 0   ;;  %s1480_s16 = smov 0   ;;  %s1653_s0 = inlined_call_operand.vmem [shape: bf16[512,36], index: 0, kind: input, shape index: {}]   ;;  %s1654_s1 = inlined_call_operand.vmem [shape: bf16[36,128], index: 1, kind: input, shape index: {}]   ;;  %s1655_s2 = inlined_call_operand.vmem [shape: f32[1,128], index: 2, kind: input, shape index: {}]   ;;  %s1656_s3 = inlined_call_operand.vmem [shape: f32[1,128], index: 3, kind: input, shape index: {}]   ;;  %s1657_s4 = inlined_call_operand.vmem [shape: bf16[512,128], index: 4, kind: output, shape index: {}]  }
   0x1   :  { %s1482_s17 = smov 0  }
   0x2 LB: > { %s26_s18 = sadd.s32 1, %s1447_s16  ;;  %p1118_p0 = scmp.ge.s32.totalorder %s1451_s17, 1  ;;  %s1451_s17 = sphi %s1482_s17, %s14_s17   ;;  %s1447_s16 = sphi %s1480_s16, %s1659_s16   ;;  %s1443_s15 = sphi %s1478_s15, %s1658_s15  }
   0x3   : > { %p28_p1 = scmp.ge.s32.totalorder %s26_s18, 2  ;;  %p191_p2 = scmp.lt.s32.totalorder %s1451_s17, 3 }
   0x5   : > { %s1661_s18 = smov (%p28_p1, %s26_s18), 0  ;;  %p192_p3 = pnand %p1118_p0, %p191_p2 }
   0x6   : > { %v1410_v0 = vld [vmem:[%s1654_s1] sm:$0xff] (!%p192_p3)   ;;  %v1411_v1 = vld [vmem:[%s1654_s1 + $0x8] sm:$0xff] (!%p192_p3)   ;;  %s1119_s23 = sshll.u32 (!%p192_p3), %s1443_s15, 5  ;;  %v1412_v2 = vld [vmem:[%s1654_s1 + $0x10] ss:$0 sps:$4 sm:$0x33] (!%p192_p3)  }
   0x7   : > { %195 = sbr.rel (%p192_p3) target bundleno = 269 (0x10d), region = 36  ;;  %1340 = vmatprep.subr.bf16.mxu0 (!%p192_p3), %v1410_v0  ;;  %1378 = vmatprep.subr.bf16.mxu1 (!%p192_p3), %v1410_v0  ;;  %p226_p4 = scmp.lt.s32.totalorder (!%p192_p3), %s1119_s23, 63  ;;  %vm496_vm0 = vcmask (!%p192_p3), 1041408   ;;  %vm447_vm1 = vcmask (!%p192_p3), 293888   ;;  %v1550_v20 = vld [vmem:[%s1655_s2] ss:$0 sm:$0xff] (!%p192_p3) }
   0x8   : > { %1341 = vmatpush3.bf16.msra.mxu0 (!%p192_p3), %v1410_v0  ;;  %1381 = vmatpush3.bf16.msra.mxu1 (!%p192_p3), %v1410_v0  ;;  %v498_v3 = vsel (!%p192_p3), %vm496_vm0, %v1412_v2, 0  ;;  %v1555_v22 = vld [vmem:[%s1656_s3] ss:$0 sm:$0xff] (!%p192_p3) }
   0x9   : > { %1342 = vmatprep.subr.bf16.mxu0 (!%p192_p3), %v1411_v1  ;;  %1379 = vmatprep.subr.bf16.mxu1 (!%p192_p3), %v1411_v1 }
   0xc   : > { %1343 = vmatpush3.bf16.msra.mxu0 (!%p192_p3), %v1411_v1  ;;  %1382 = vmatpush3.bf16.msra.mxu1 (!%p192_p3), %v1411_v1 }
   0xd   : > { %1384 = vmatprep.subr.msk.bf16.mxu0 (!%p192_p3), %vm496_vm0, %v1412_v2  ;;  %1385 = vmatprep.subr.msk.bf16.mxu1 (!%p192_p3), %vm496_vm0, %v1412_v2 }
   0xe   : > { %s1663_s23 = smov (!%p226_p4, %s1119_s23), 63 }
   0xf   : > { %s1120_s26 = sshll.u32 %s1663_s23, 2 }
  0x10   : > { %s1513_s29 = scalar_lea.vmem %s1653_s0, %s1120_s26  ;;  %1345 = vmatpush3.bf16.msra.mxu0 %v498_v3  ;;  %1383 = vmatpush3.bf16.msra.mxu1 %v498_v3  ;;  %s1578_s10 = scalar_lea.vmem %s1657_s4, %s1120_s26 }
  0x11   : > { %v1413_v4 = vld [vmem:[%s1513_s29] sm:$0xff]   ;;  %v1415_v6 = vld [vmem:[%s1513_s29 + $0x8] sm:$0xff]   ;;  %v1417_v8 = vld [vmem:[%s1513_s29 + $0x10] sm:$0xff]  }
  0x12   : > { %v1414_v5 = vld [vmem:[%s1513_s29 + $0x40] sm:$0xff]   ;;  %1346 = vmatprep.mubr.msk.bf16.mxu0 %vm447_vm1, %v1413_v4  ;;  %v1416_v7 = vld [vmem:[%s1513_s29 + $0x48] sm:$0xff]   ;;  %v1418_v9 = vld [vmem:[%s1513_s29 + $0x50] sm:$0xff]  }
  0x13   : > { %1362 = vmatprep.mubr.msk.bf16.mxu1 %vm447_vm1, %v1414_v5  ;;  %1347 = vmatmul.mubr.msk.bf16.vlgmr.msra.gmra.mrb[0].mxu0 %vm447_vm1, %v1415_v6  ;;  %v1419_v10 = vld [vmem:[%s1513_s29 + $0x18] sm:$0xff]   ;;  %v1421_v12 = vld [vmem:[%s1513_s29 + $0x20] sm:$0xff]   ;;  %v1423_v14 = vld [vmem:[%s1513_s29 + $0x28] sm:$0xff]  }
  0x14   : > { %1363 = vmatmul.mubr.msk.bf16.vlgmr.msra.gmra.mrb[0].mxu1 %vm447_vm1, %v1416_v7  ;;  %1350 = vmatprep.mubr.msk.bf16.mxu0 %vm447_vm1, %v1417_v8  ;;  %v1420_v11 = vld [vmem:[%s1513_s29 + $0x58] sm:$0xff]   ;;  %v1422_v13 = vld [vmem:[%s1513_s29 + $0x60] sm:$0xff]   ;;  %v1424_v15 = vld [vmem:[%s1513_s29 + $0x68] sm:$0xff]  }
  0x15   : > { %1366 = vmatprep.mubr.msk.bf16.mxu1 %vm447_vm1, %v1418_v9  ;;  %v1425_v16 = vld [vmem:[%s1513_s29 + $0x30] sm:$0xff]   ;;  %v1427_v18 = vld [vmem:[%s1513_s29 + $0x38] sm:$0xff]  }
  0x16   : > { %v1426_v17 = vld [vmem:[%s1513_s29 + $0x70] sm:$0xff]   ;;  %v1428_v19 = vld [vmem:[%s1513_s29 + $0x78] sm:$0xff]  }
  0x1b   : > { %1351 = vmatmul.mubr.msk.bf16.gmra.mrb[4].mxu0 %vm447_vm1, %v1419_v10 }
  0x1c   : > { %1367 = vmatmul.mubr.msk.bf16.gmra.mrb[4].mxu1 %vm447_vm1, %v1420_v11  ;;  %1354 = vmatprep.mubr.msk.bf16.mxu0 %vm447_vm1, %v1421_v12 }
  0x1d   : > { %1370 = vmatprep.mubr.msk.bf16.mxu1 %vm447_vm1, %v1422_v13 }
  0x23   : > { %1355 = vmatmul.mubr.msk.bf16.gmra.mrb[8].mxu0 %vm447_vm1, %v1423_v14 }
  0x24   : > { %1371 = vmatmul.mubr.msk.bf16.gmra.mrb[8].mxu1 %vm447_vm1, %v1424_v15  ;;  %1358 = vmatprep.mubr.msk.bf16.mxu0 %vm447_vm1, %v1425_v16 }
  0x25   : > { %1374 = vmatprep.mubr.msk.bf16.mxu1 %vm447_vm1, %v1426_v17 }
  0x2b   : > { %1359 = vmatmul.mubr.msk.bf16.gmra.mrb[12].mxu0 %vm447_vm1, %v1427_v18 }
  0x2c   : > { %1375 = vmatmul.mubr.msk.bf16.gmra.mrb[12].mxu1 %vm447_vm1, %v1428_v19 }
  0xe6   : > { %v1348_v21 = vpop.f32.mrb[0].mxu0 }
  0xe7   : > { %v1364_v23 = vpop.f32.mrb[0].mxu1  ;;  %v769_v24 = vmul.f32 %v1348_v21, %v1550_v20  ;;  %v534_v26 = vpop.f32.mrb[1].mxu0 }
  0xe8   : > { %v785_v25 = vmul.f32 %v1364_v23, %v1550_v20  ;;  %v598_v27 = vpop.f32.mrb[1].mxu1  ;;  %v767_v28 = vmul.f32 %v1550_v20, %v534_v26  ;;  %v1349_v30 = vpop.f32.mrb[2].mxu0 }
  0xe9   : > { %v783_v29 = vmul.f32 %v1550_v20, %v598_v27  ;;  %v1365_v31 = vpop.f32.mrb[2].mxu1  ;;  %v808_v32 = vadd.f32 %v1555_v22, %v769_v24  ;;  %v770_v34 = vmul.f32 %v1349_v30, %v1550_v20  ;;  %v537_v36 = vpop.f32.mrb[3].mxu0 }
  0xea   : > { %v824_v33 = vadd.f32 %v1555_v22, %v785_v25  ;;  %v786_v35 = vmul.f32 %v1365_v31, %v1550_v20  ;;  %v601_v37 = vpop.f32.mrb[3].mxu1  ;;  %v806_v38 = vadd.f32 %v1555_v22, %v767_v28  ;;  %v768_v40 = vmul.f32 %v1550_v20, %v537_v36 }
  0xeb   : > { %v822_v39 = vadd.f32 %v1555_v22, %v783_v29  ;;  %v784_v41 = vmul.f32 %v1550_v20, %v601_v37  ;;  %v809_v42 = vadd.f32 %v1555_v22, %v770_v34  ;;  %v840_v46 = vmax.f32 %v808_v32, 0.0 }
  0xec   : > { %v825_v43 = vadd.f32 %v1555_v22, %v786_v35  ;;  %v807_v44 = vadd.f32 %v1555_v22, %v768_v40  ;;  %v856_v47 = vmax.f32 %v824_v33, 0.0  ;;  %v838_v50 = vmax.f32 %v806_v38, 0.0 }
  0xed   : > { %v823_v45 = vadd.f32 %v1555_v22, %v784_v41  ;;  %v841_v48 = vmax.f32 %v809_v42, 0.0  ;;  %v854_v51 = vmax.f32 %v822_v39, 0.0 }
  0xee   : > { %v857_v49 = vmax.f32 %v825_v43, 0.0  ;;  %v839_v52 = vmax.f32 %v807_v44, 0.0  ;;  %v1352_v54 = vpop.f32.mrb[4].mxu0 }
  0xef   : > { %v855_v53 = vmax.f32 %v823_v45, 0.0  ;;  %v1368_v55 = vpop.f32.mrb[4].mxu1  ;;  %v1234_v56 = vpack.c.bf16 %v841_v48, %v840_v46  ;;  %v773_v58 = vmul.f32 %v1352_v54, %v1550_v20  ;;  %v550_v60 = vpop.f32.mrb[5].mxu0 }
  0xf0   : > { %v1274_v57 = vpack.c.bf16 %v857_v49, %v856_v47  ;;  %v789_v59 = vmul.f32 %v1368_v55, %v1550_v20  ;;  %v614_v61 = vpop.f32.mrb[5].mxu1  ;;  %v1229_v62 = vpack.c.bf16 %v839_v52, %v838_v50  ;;  %v771_v0 = vmul.f32 %v1550_v20, %v550_v60  ;;  %v1353_v2 = vpop.f32.mrb[6].mxu0 }
  0xf1   : > { %v1269_v63 = vpack.c.bf16 %v855_v53, %v854_v51  ;;  %v787_v1 = vmul.f32 %v1550_v20, %v614_v61  ;;  %v1369_v3 = vpop.f32.mrb[6].mxu1  ;;  %1306 = vst [vmem:[%s1578_s10 + $0x8] sm:$0xff] %v1234_v56   ;;  %v812_v4 = vadd.f32 %v1555_v22, %v773_v58  ;;  %v774_v6 = vmul.f32 %v1353_v2, %v1550_v20  ;;  %v553_v8 = vpop.f32.mrb[7].mxu0 }
  0xf2   : > { %1314 = vst [vmem:[%s1578_s10 + $0x48] sm:$0xff] %v1274_v57   ;;  %v828_v5 = vadd.f32 %v1555_v22, %v789_v59  ;;  %v790_v7 = vmul.f32 %v1369_v3, %v1550_v20  ;;  %v617_v9 = vpop.f32.mrb[7].mxu1  ;;  %1230 = vst [vmem:[%s1578_s10] sm:$0xff] %v1229_v62   ;;  %v810_v10 = vadd.f32 %v1555_v22, %v771_v0 }
  0xf3   : > { %1313 = vst [vmem:[%s1578_s10 + $0x40] sm:$0xff] %v1269_v63   ;;  %v826_v11 = vadd.f32 %v1555_v22, %v787_v1  ;;  %v772_v12 = vmul.f32 %v1550_v20, %v553_v8  ;;  %v788_v13 = vmul.f32 %v1550_v20, %v617_v9  ;;  %v813_v14 = vadd.f32 %v1555_v22, %v774_v6 }
  0xf4   : > { %v829_v15 = vadd.f32 %v1555_v22, %v790_v7  ;;  %v844_v18 = vmax.f32 %v812_v4, 0.0  ;;  %v860_v19 = vmax.f32 %v828_v5, 0.0  ;;  %v842_v24 = vmax.f32 %v810_v10, 0.0 }
  0xf5   : > { %v811_v16 = vadd.f32 %v1555_v22, %v772_v12  ;;  %v827_v17 = vadd.f32 %v1555_v22, %v788_v13  ;;  %v845_v21 = vmax.f32 %v813_v14, 0.0  ;;  %v858_v25 = vmax.f32 %v826_v11, 0.0 }
  0xf6   : > { %v861_v23 = vmax.f32 %v829_v15, 0.0  ;;  %v1356_v28 = vpop.f32.mrb[8].mxu0 }
  0xf7   : > { %v843_v26 = vmax.f32 %v811_v16, 0.0  ;;  %v859_v27 = vmax.f32 %v827_v17, 0.0  ;;  %v1372_v29 = vpop.f32.mrb[8].mxu1  ;;  %v1244_v30 = vpack.c.bf16 %v845_v21, %v844_v18  ;;  %v777_v32 = vmul.f32 %v1356_v28, %v1550_v20  ;;  %v566_v34 = vpop.f32.mrb[9].mxu0 }
  0xf8   : > { %v1284_v31 = vpack.c.bf16 %v861_v23, %v860_v19  ;;  %v793_v33 = vmul.f32 %v1372_v29, %v1550_v20  ;;  %v630_v35 = vpop.f32.mrb[9].mxu1  ;;  %v775_v38 = vmul.f32 %v1550_v20, %v566_v34  ;;  %v1357_v40 = vpop.f32.mrb[10].mxu0 }
  0xf9   : > { %v1239_v36 = vpack.c.bf16 %v843_v26, %v842_v24  ;;  %v1279_v37 = vpack.c.bf16 %v859_v27, %v858_v25  ;;  %v791_v39 = vmul.f32 %v1550_v20, %v630_v35  ;;  %v1373_v41 = vpop.f32.mrb[10].mxu1  ;;  %1308 = vst [vmem:[%s1578_s10 + $0x18] sm:$0xff] %v1244_v30   ;;  %v816_v42 = vadd.f32 %v1555_v22, %v777_v32  ;;  %v569_v46 = vpop.f32.mrb[11].mxu0 }
  0xfa   : > { %1316 = vst [vmem:[%s1578_s10 + $0x58] sm:$0xff] %v1284_v31   ;;  %v832_v43 = vadd.f32 %v1555_v22, %v793_v33  ;;  %v778_v44 = vmul.f32 %v1357_v40, %v1550_v20  ;;  %v794_v45 = vmul.f32 %v1373_v41, %v1550_v20  ;;  %v633_v47 = vpop.f32.mrb[11].mxu1  ;;  %v814_v48 = vadd.f32 %v1555_v22, %v775_v38 }
  0xfb   : > { %1307 = vst [vmem:[%s1578_s10 + $0x10] sm:$0xff] %v1239_v36   ;;  %1315 = vst [vmem:[%s1578_s10 + $0x50] sm:$0xff] %v1279_v37   ;;  %v830_v49 = vadd.f32 %v1555_v22, %v791_v39  ;;  %v776_v50 = vmul.f32 %v1550_v20, %v569_v46  ;;  %v792_v51 = vmul.f32 %v1550_v20, %v633_v47  ;;  %v848_v56 = vmax.f32 %v816_v42, 0.0 }
  0xfc   : > { %v817_v52 = vadd.f32 %v1555_v22, %v778_v44  ;;  %v833_v53 = vadd.f32 %v1555_v22, %v794_v45  ;;  %v864_v57 = vmax.f32 %v832_v43, 0.0  ;;  %v846_v60 = vmax.f32 %v814_v48, 0.0 }
  0xfd   : > { %v815_v54 = vadd.f32 %v1555_v22, %v776_v50  ;;  %v831_v55 = vadd.f32 %v1555_v22, %v792_v51  ;;  %v862_v61 = vmax.f32 %v830_v49, 0.0 }
  0xfe   : > { %v849_v58 = vmax.f32 %v817_v52, 0.0  ;;  %v865_v59 = vmax.f32 %v833_v53, 0.0  ;;  %v1360_v0 = vpop.f32.mrb[12].mxu0 }
  0xff   : > { %v847_v62 = vmax.f32 %v815_v54, 0.0  ;;  %v863_v63 = vmax.f32 %v831_v55, 0.0  ;;  %v1376_v1 = vpop.f32.mrb[12].mxu1  ;;  %v781_v4 = vmul.f32 %v1360_v0, %v1550_v20  ;;  %v582_v6 = vpop.f32.mrb[13].mxu0 }
 0x100   : > { %v1254_v2 = vpack.c.bf16 %v849_v58, %v848_v56  ;;  %v1294_v3 = vpack.c.bf16 %v865_v59, %v864_v57  ;;  %v797_v5 = vmul.f32 %v1376_v1, %v1550_v20  ;;  %v646_v7 = vpop.f32.mrb[13].mxu1  ;;  %v779_v10 = vmul.f32 %v1550_v20, %v582_v6  ;;  %v1361_v12 = vpop.f32.mrb[14].mxu0 }
 0x101   : > { %v1249_v8 = vpack.c.bf16 %v847_v62, %v846_v60  ;;  %v1289_v9 = vpack.c.bf16 %v863_v63, %v862_v61  ;;  %v795_v11 = vmul.f32 %v1550_v20, %v646_v7  ;;  %v1377_v13 = vpop.f32.mrb[14].mxu1  ;;  %v820_v14 = vadd.f32 %v1555_v22, %v781_v4  ;;  %v585_v18 = vpop.f32.mrb[15].mxu0 }
 0x102   : > { %1310 = vst [vmem:[%s1578_s10 + $0x28] sm:$0xff] %v1254_v2   ;;  %1318 = vst [vmem:[%s1578_s10 + $0x68] sm:$0xff] %v1294_v3   ;;  %v836_v15 = vadd.f32 %v1555_v22, %v797_v5  ;;  %v782_v16 = vmul.f32 %v1361_v12, %v1550_v20  ;;  %v798_v17 = vmul.f32 %v1377_v13, %v1550_v20  ;;  %v649_v19 = vpop.f32.mrb[15].mxu1 }
 0x103   : > { %1309 = vst [vmem:[%s1578_s10 + $0x20] sm:$0xff] %v1249_v8   ;;  %1317 = vst [vmem:[%s1578_s10 + $0x60] sm:$0xff] %v1289_v9   ;;  %v818_v21 = vadd.f32 %v1555_v22, %v779_v10  ;;  %v834_v23 = vadd.f32 %v1555_v22, %v795_v11  ;;  %v780_v24 = vmul.f32 %v1550_v20, %v585_v18  ;;  %v852_v30 = vmax.f32 %v820_v14, 0.0 }
 0x104   : > { %v796_v25 = vmul.f32 %v1550_v20, %v649_v19  ;;  %v821_v26 = vadd.f32 %v1555_v22, %v782_v16  ;;  %v837_v27 = vadd.f32 %v1555_v22, %v798_v17  ;;  %v868_v31 = vmax.f32 %v836_v15, 0.0 }
 0x105   : > { %v819_v28 = vadd.f32 %v1555_v22, %v780_v24  ;;  %v850_v34 = vmax.f32 %v818_v21, 0.0  ;;  %v866_v35 = vmax.f32 %v834_v23, 0.0 }
 0x106   : > { %v835_v29 = vadd.f32 %v1555_v22, %v796_v25  ;;  %v853_v32 = vmax.f32 %v821_v26, 0.0  ;;  %v869_v33 = vmax.f32 %v837_v27, 0.0 }
 0x107   : > { %v851_v36 = vmax.f32 %v819_v28, 0.0 }
 0x108   : > { %v867_v20 = vmax.f32 %v835_v29, 0.0  ;;  %v1264_v37 = vpack.c.bf16 %v853_v32, %v852_v30  ;;  %v1304_v38 = vpack.c.bf16 %v869_v33, %v868_v31 }
 0x109   : > { %v1259_v39 = vpack.c.bf16 %v851_v36, %v850_v34 }
 0x10a   : > { %v1299_v40 = vpack.c.bf16 %v867_v20, %v866_v35  ;;  %1312 = vst [vmem:[%s1578_s10 + $0x38] sm:$0xff] %v1264_v37   ;;  %1320 = vst [vmem:[%s1578_s10 + $0x78] sm:$0xff] %v1304_v38  }
 0x10b   : > { %1311 = vst [vmem:[%s1578_s10 + $0x30] sm:$0xff] %v1259_v39  }
 0x10c   : > { %1319 = vst [vmem:[%s1578_s10 + $0x70] sm:$0xff] %v1299_v40  }
 0x10d PF: > { %s14_s17 = sadd.s32 1, %s1451_s17   ;;  %s1658_s15 = smov %s1447_s16 }
 0x10e   : > { %p11_p5 = scmp.ge.s32.totalorder %s14_s17, 4   ;;  %s1659_s16 = smov %s1661_s18 }
 0x110   :  { %13 = sbr.rel (!%p11_p5) target bundleno = 2 (0x2), region = 77 }

// kernel: residual_block_forward.3
= control target key start
LH: loop header
LB: loop body
LE: loop exit
PB: predicated region body
PF: predicated region fallthrough
CT: control target
= control target key end

     0   :  { %s1912_s27 = smov 0   ;;  %s1914_s28 = smov 0   ;;  %s2224_s0 = inlined_call_operand.vmem [shape: bf16[512,72], index: 0, kind: input, shape index: {}]   ;;  %s2225_s1 = inlined_call_operand.vmem [shape: bf16[72,128], index: 1, kind: input, shape index: {}]   ;;  %s2226_s2 = inlined_call_operand.vmem [shape: f32[1,128], index: 2, kind: input, shape index: {}]   ;;  %s2227_s3 = inlined_call_operand.vmem [shape: f32[1,128], index: 3, kind: input, shape index: {}]   ;;  %s2228_s4 = inlined_call_operand.vmem [shape: bf16[512,8], index: 4, kind: input, shape index: {}]   ;;  %s2229_s5 = inlined_call_operand.vmem [shape: bf16[8,128], index: 5, kind: input, shape index: {}]   ;;  %s2230_s6 = inlined_call_operand.vmem [shape: f32[1,128], index: 6, kind: input, shape index: {}]   ;;  %s2231_s7 = inlined_call_operand.vmem [shape: f32[1,128], index: 7, kind: input, shape index: {}]   ;;  %s2232_s8 = inlined_call_operand.vmem [shape: f32[512,128], index: 8, kind: output, shape index: {}]  }
   0x1   :  { %s1916_s29 = smov 0  }
   0x2 LB: > { %s30_s30 = sadd.s32 1, %s1861_s28  ;;  %p1584_p0 = scmp.ge.s32.totalorder %s1865_s29, 1  ;;  %s1865_s29 = sphi %s1916_s29, %s18_s29   ;;  %s1861_s28 = sphi %s1914_s28, %s2234_s28   ;;  %s1857_s27 = sphi %s1912_s27, %s2233_s27  }
   0x3   : > { %p32_p1 = scmp.ge.s32.totalorder %s30_s30, 2  ;;  %p302_p2 = scmp.lt.s32.totalorder %s1865_s29, 3 }
   0x5   : > { %s2236_s30 = smov (%p32_p1, %s30_s30), 0  ;;  %p303_p3 = pnand %p1584_p0, %p302_p2 }
   0x6   : > { %v1806_v0 = vld [vmem:[%s2225_s1] sm:$0xff] (!%p303_p3)   ;;  %v1807_v1 = vld [vmem:[%s2225_s1 + $0x8] sm:$0xff] (!%p303_p3)   ;;  %s1585_s13 = sshll.u32 (!%p303_p3), %s1857_s27, 5  ;;  %vm642_vm0 = vcmask (!%p303_p3), 1043456   ;;  %v1808_v2 = vld [vmem:[%s2225_s1 + $0x10] sm:$0xff] (!%p303_p3)   ;;  %vm1097_vm1 = vcmask (!%p303_p3), 64512  }
   0x7   : > { %306 = sbr.rel (%p303_p3) target bundleno = 307 (0x133), region = 52  ;;  %1704 = vmatprep.subr.bf16.mxu0 (!%p303_p3), %v1806_v0  ;;  %p350_p4 = scmp.lt.s32.totalorder (!%p303_p3), %s1585_s13, 63  ;;  %v1016_v3 = vld [vmem:[%s2229_s5] sm:$0xf] (!%p303_p3)  ;;  %v1809_v5 = vld [vmem:[%s2225_s1 + $0x18] sm:$0xff] (!%p303_p3)   ;;  %vm593_vm2 = vcmask (!%p303_p3), 588800  }
   0x8   : > { %1705 = vmatpush3.bf16.msra.mxu0 (!%p303_p3), %v1806_v0  ;;  %1781 = vmatprep.subr.msk.bf16.mxu1 (!%p303_p3), %vm642_vm0, %v1016_v3  ;;  %v1147_v4 = vsel (!%p303_p3), %vm642_vm0, %v1016_v3, 0  ;;  %v1810_v9 = vld [vmem:[%s2225_s1 + $0x20] ss:$0 sps:$4 sm:$0xff] (!%p303_p3)  }
   0x9   : > { %1706 = vmatprep.subr.bf16.mxu0 (!%p303_p3), %v1807_v1  ;;  %1747 = vmatpush3.bf16.msra.mxu1 (!%p303_p3), %v1147_v4  ;;  %v644_v11 = vsel (!%p303_p3), %vm642_vm0, %v1810_v9, 0  ;;  %v2032_v44 = vld [vmem:[%s2230_s6] ss:$0 sm:$0xff] (!%p303_p3) }
   0xa   : > { %v2038_v46 = vld [vmem:[%s2231_s7] ss:$0 sm:$0xff] (!%p303_p3) }
   0xb   : > { %v2044_v48 = vld [vmem:[%s2226_s2] ss:$0 sm:$0xff] (!%p303_p3) }
   0xc   : > { %1707 = vmatpush3.bf16.msra.mxu0 (!%p303_p3), %v1807_v1  ;;  %v2049_v52 = vld [vmem:[%s2227_s3] ss:$0 sm:$0xff] (!%p303_p3) }
   0xd   : > { %1708 = vmatprep.subr.bf16.mxu0 (!%p303_p3), %v1808_v2 }
   0xe   : > { %s2238_s13 = smov (!%p350_p4, %s1585_s13), 63 }
   0xf   : > { %s1586_s18 = sshll.u32 %s2238_s13, 2  ;;  %s1590_s19 = sshll.u32 %s2238_s13, 3 }
  0x10   : > { %s1953_s23 = scalar_lea.vmem %s2228_s4, %s1586_s18  ;;  %s1958_s26 = scalar_lea.vmem %s2224_s0, %s1586_s18  ;;  %1709 = vmatpush3.bf16.msra.mxu0 %v1808_v2 }
  0x11   : > { %v1811_v6 = vld [vmem:[%s1953_s23] sm:$0xff]   ;;  %v1812_v7 = vld [vmem:[%s1953_s23 + $0x8] sm:$0xff]   ;;  %1710 = vmatprep.subr.bf16.mxu0 %v1809_v5  ;;  %v1815_v10 = vld [vmem:[%s1953_s23 + $0x10] sm:$0xff]   ;;  %s2068_s13 = scalar_lea.vmem %s2232_s8, %s1590_s19 }
  0x12   : > { %1748 = vmatprep.mubr.msk.bf16.mxu1 %vm1097_vm1, %v1811_v6  ;;  %v1813_v8 = vld [vmem:[%s1958_s26] sm:$0xff]   ;;  %v1816_v12 = vld [vmem:[%s1953_s23 + $0x18] sm:$0xff]   ;;  %v1814_v14 = vld [vmem:[%s1958_s26 + $0x8] sm:$0xff]  }
  0x13   : > { %1749 = vmatmul.mubr.msk.bf16.vlgmr.msra.gmra.mrb[0].mxu1 %vm1097_vm1, %v1812_v7  ;;  %1714 = vmatprep.mubr.msk.bf16.mxu0 %vm593_vm2, %v1813_v8  ;;  %v1819_v13 = vld [vmem:[%s1953_s23 + $0x20] sm:$0xff]   ;;  %v1817_v15 = vld [vmem:[%s1958_s26 + $0x10] sm:$0xff]   ;;  %v1820_v16 = vld [vmem:[%s1953_s23 + $0x28] sm:$0xff]  }
  0x14   : > { %1711 = vmatpush3.bf16.msra.mxu0 %v1809_v5  ;;  %1752 = vmatprep.mubr.msk.bf16.mxu1 %vm1097_vm1, %v1815_v10  ;;  %v1823_v17 = vld [vmem:[%s1953_s23 + $0x30] sm:$0xff]   ;;  %v1818_v18 = vld [vmem:[%s1958_s26 + $0x18] sm:$0xff]   ;;  %v1821_v19 = vld [vmem:[%s1958_s26 + $0x20] sm:$0xff]  }
  0x15   : > { %1780 = vmatprep.subr.msk.bf16.mxu0 %vm642_vm0, %v1810_v9  ;;  %v1824_v20 = vld [vmem:[%s1953_s23 + $0x38] sm:$0xff]   ;;  %v1827_v21 = vld [vmem:[%s1953_s23 + $0x40] sm:$0xff]   ;;  %v1822_v22 = vld [vmem:[%s1958_s26 + $0x28] sm:$0xff]  }
  0x16   : > { %v1825_v23 = vld [vmem:[%s1958_s26 + $0x30] sm:$0xff]   ;;  %v1828_v24 = vld [vmem:[%s1953_s23 + $0x48] sm:$0xff]   ;;  %v1826_v26 = vld [vmem:[%s1958_s26 + $0x38] sm:$0xff]  }
  0x17   : > { %v1831_v25 = vld [vmem:[%s1953_s23 + $0x50] sm:$0xff]   ;;  %v1829_v27 = vld [vmem:[%s1958_s26 + $0x40] sm:$0xff]   ;;  %v1832_v28 = vld [vmem:[%s1953_s23 + $0x58] sm:$0xff]  }
  0x18   : > { %1713 = vmatpush3.bf16.msra.mxu0 %v644_v11  ;;  %v1835_v29 = vld [vmem:[%s1953_s23 + $0x60] sm:$0xff]   ;;  %v1830_v30 = vld [vmem:[%s1958_s26 + $0x48] sm:$0xff]   ;;  %v1833_v31 = vld [vmem:[%s1958_s26 + $0x50] sm:$0xff]  }
  0x19   : > { %v1836_v32 = vld [vmem:[%s1953_s23 + $0x68] sm:$0xff]   ;;  %v1839_v33 = vld [vmem:[%s1953_s23 + $0x70] sm:$0xff]   ;;  %v1834_v34 = vld [vmem:[%s1958_s26 + $0x58] sm:$0xff]  }
  0x1a   : > { %v1837_v35 = vld [vmem:[%s1958_s26 + $0x60] sm:$0xff]   ;;  %v1840_v36 = vld [vmem:[%s1953_s23 + $0x78] sm:$0xff]   ;;  %v1838_v37 = vld [vmem:[%s1958_s26 + $0x68] sm:$0xff]  }
  0x1b   : > { %1753 = vmatmul.mubr.msk.bf16.gmra.mrb[4].mxu1 %vm1097_vm1, %v1816_v12  ;;  %1715 = vmatmul.mubr.msk.bf16.vlgmr.msra.gmra.mrb[0].mxu0 %vm593_vm2, %v1814_v14  ;;  %v1841_v38 = vld [vmem:[%s1958_s26 + $0x70] sm:$0xff]   ;;  %v1842_v39 = vld [vmem:[%s1958_s26 + $0x78] sm:$0xff]  }
  0x1c   : > { %1756 = vmatprep.mubr.msk.bf16.mxu1 %vm1097_vm1, %v1819_v13  ;;  %1718 = vmatprep.mubr.msk.bf16.mxu0 %vm593_vm2, %v1817_v15 }
  0x23   : > { %1757 = vmatmul.mubr.msk.bf16.gmra.mrb[8].mxu1 %vm1097_vm1, %v1820_v16  ;;  %1719 = vmatmul.mubr.msk.bf16.gmra.mrb[4].mxu0 %vm593_vm2, %v1818_v18 }
  0x24   : > { %1760 = vmatprep.mubr.msk.bf16.mxu1 %vm1097_vm1, %v1823_v17  ;;  %1722 = vmatprep.mubr.msk.bf16.mxu0 %vm593_vm2, %v1821_v19 }
  0x2b   : > { %1761 = vmatmul.mubr.msk.bf16.gmra.mrb[12].mxu1 %vm1097_vm1, %v1824_v20  ;;  %1723 = vmatmul.mubr.msk.bf16.gmra.mrb[8].mxu0 %vm593_vm2, %v1822_v22 }
  0x2c   : > { %1764 = vmatprep.mubr.msk.bf16.mxu1 %vm1097_vm1, %v1827_v21  ;;  %1726 = vmatprep.mubr.msk.bf16.mxu0 %vm593_vm2, %v1825_v23 }
  0x33   : > { %1765 = vmatmul.mubr.msk.bf16.gmra.mrb[16].mxu1 %vm1097_vm1, %v1828_v24  ;;  %1727 = vmatmul.mubr.msk.bf16.gmra.mrb[12].mxu0 %vm593_vm2, %v1826_v26 }
  0x34   : > { %1768 = vmatprep.mubr.msk.bf16.mxu1 %vm1097_vm1, %v1831_v25  ;;  %1730 = vmatprep.mubr.msk.bf16.mxu0 %vm593_vm2, %v1829_v27 }
  0x3b   : > { %1769 = vmatmul.mubr.msk.bf16.gmra.mrb[20].mxu1 %vm1097_vm1, %v1832_v28  ;;  %1731 = vmatmul.mubr.msk.bf16.gmra.mrb[16].mxu0 %vm593_vm2, %v1830_v30 }
  0x3c   : > { %1772 = vmatprep.mubr.msk.bf16.mxu1 %vm1097_vm1, %v1835_v29  ;;  %1734 = vmatprep.mubr.msk.bf16.mxu0 %vm593_vm2, %v1833_v31 }
  0x43   : > { %1773 = vmatmul.mubr.msk.bf16.gmra.mrb[24].mxu1 %vm1097_vm1, %v1836_v32  ;;  %1735 = vmatmul.mubr.msk.bf16.gmra.mrb[20].mxu0 %vm593_vm2, %v1834_v34 }
  0x44   : > { %1776 = vmatprep.mubr.msk.bf16.mxu1 %vm1097_vm1, %v1839_v33  ;;  %1738 = vmatprep.mubr.msk.bf16.mxu0 %vm593_vm2, %v1837_v35 }
  0x4b   : > { %1777 = vmatmul.mubr.msk.bf16.gmra.mrb[28].mxu1 %vm1097_vm1, %v1840_v36  ;;  %1739 = vmatmul.mubr.msk.bf16.gmra.mrb[24].mxu0 %vm593_vm2, %v1838_v37 }
  0x4c   : > { %1742 = vmatprep.mubr.msk.bf16.mxu0 %vm593_vm2, %v1841_v38 }
  0x53   : > { %1743 = vmatmul.mubr.msk.bf16.gmra.mrb[28].mxu0 %vm593_vm2, %v1842_v39 }
  0xe6   : > { %v1750_v40 = vpop.f32.mrb[0].mxu1 }
  0xe7   : > { %v1183_v41 = vpop.f32.mrb[1].mxu1  ;;  %v1319_v45 = vmul.f32 %v1750_v40, %v2032_v44 }
  0xe8   : > { %v1751_v42 = vpop.f32.mrb[2].mxu1  ;;  %v1317_v47 = vmul.f32 %v2032_v44, %v1183_v41 }
  0xe9   : > { %v1186_v43 = vpop.f32.mrb[3].mxu1  ;;  %v1358_v54 = vadd.f32 %v2038_v46, %v1319_v45  ;;  %v1320_v55 = vmul.f32 %v1751_v42, %v2032_v44 }
  0xea   : > { %v1356_v59 = vadd.f32 %v2038_v46, %v1317_v47  ;;  %v1318_v60 = vmul.f32 %v2032_v44, %v1186_v43 }
  0xeb   : > { %v1359_v4 = vadd.f32 %v2038_v46, %v1320_v55 }
  0xec   : > { %v1357_v8 = vadd.f32 %v2038_v46, %v1318_v60 }
  0xee   : > { %v1754_v49 = vpop.f32.mrb[4].mxu1  ;;  %v1716_v51 = vpop.f32.mrb[0].mxu0 }
  0xef   : > { %v1199_v50 = vpop.f32.mrb[5].mxu1  ;;  %v915_v56 = vmul.f32 %v1716_v51, %v2044_v48  ;;  %v680_v57 = vpop.f32.mrb[1].mxu0  ;;  %v1323_v7 = vmul.f32 %v1754_v49, %v2032_v44 }
  0xf0   : > { %v1755_v53 = vpop.f32.mrb[6].mxu1  ;;  %v913_v61 = vmul.f32 %v2044_v48, %v680_v57  ;;  %v1717_v62 = vpop.f32.mrb[2].mxu0  ;;  %v1321_v11 = vmul.f32 %v2032_v44, %v1199_v50 }
  0xf1   : > { %v1202_v58 = vpop.f32.mrb[7].mxu1  ;;  %v954_v63 = vadd.f32 %v2049_v52, %v915_v56  ;;  %v916_v0 = vmul.f32 %v1717_v62, %v2044_v48  ;;  %v683_v1 = vpop.f32.mrb[3].mxu0  ;;  %v1362_v21 = vadd.f32 %v2038_v46, %v1323_v7  ;;  %v1324_v22 = vmul.f32 %v1755_v53, %v2032_v44 }
  0xf2   : > { %v952_v2 = vadd.f32 %v2049_v52, %v913_v61  ;;  %v914_v3 = vmul.f32 %v2044_v48, %v683_v1  ;;  %v1360_v27 = vadd.f32 %v2038_v46, %v1321_v11  ;;  %v1322_v28 = vmul.f32 %v2032_v44, %v1202_v58 }
  0xf3   : > { %v1390_v5 = vadd.f32 %v1358_v54, %v954_v63  ;;  %v955_v6 = vadd.f32 %v2049_v52, %v916_v0  ;;  %v1363_v36 = vadd.f32 %v2038_v46, %v1324_v22 }
  0xf4   : > { %v1388_v9 = vadd.f32 %v1356_v59, %v952_v2  ;;  %v953_v10 = vadd.f32 %v2049_v52, %v914_v3  ;;  %v1361_v40 = vadd.f32 %v2038_v46, %v1322_v28 }
  0xf5   : > { %v1422_v13 = vmax.f32 %v1390_v5, 0.0  ;;  %v1391_v14 = vadd.f32 %v1359_v4, %v955_v6 }
  0xf6   : > { %v1758_v12 = vpop.f32.mrb[8].mxu1  ;;  %v1420_v16 = vmax.f32 %v1388_v9, 0.0  ;;  %v1389_v17 = vadd.f32 %v1357_v8, %v953_v10  ;;  %v1720_v18 = vpop.f32.mrb[4].mxu0 }
  0xf7   : > { %v1215_v15 = vpop.f32.mrb[9].mxu1  ;;  %1454 = vst [vmem:[%s2068_s13 + $0x10] sm:$0xff] %v1422_v13  ;;  %v1423_v20 = vmax.f32 %v1391_v14, 0.0  ;;  %v919_v23 = vmul.f32 %v1720_v18, %v2044_v48  ;;  %v696_v24 = vpop.f32.mrb[5].mxu0  ;;  %v1327_v39 = vmul.f32 %v1758_v12, %v2032_v44 }
  0xf8   : > { %v1759_v19 = vpop.f32.mrb[10].mxu1  ;;  %1452 = vst [vmem:[%s2068_s13] sm:$0xff] %v1420_v16  ;;  %v1421_v26 = vmax.f32 %v1389_v17, 0.0  ;;  %v917_v29 = vmul.f32 %v2044_v48, %v696_v24  ;;  %v1721_v30 = vpop.f32.mrb[6].mxu0  ;;  %v1325_v43 = vmul.f32 %v2032_v44, %v1215_v15 }
  0xf9   : > { %v1218_v25 = vpop.f32.mrb[11].mxu1  ;;  %1455 = vst [vmem:[%s2068_s13 + $0x18] sm:$0xff] %v1423_v20  ;;  %v958_v31 = vadd.f32 %v2049_v52, %v919_v23  ;;  %v920_v32 = vmul.f32 %v1721_v30, %v2044_v48  ;;  %v699_v33 = vpop.f32.mrb[7].mxu0  ;;  %v1366_v57 = vadd.f32 %v2038_v46, %v1327_v39  ;;  %v1328_v58 = vmul.f32 %v1759_v19, %v2032_v44 }
  0xfa   : > { %1453 = vst [vmem:[%s2068_s13 + $0x8] sm:$0xff] %v1421_v26  ;;  %v956_v34 = vadd.f32 %v2049_v52, %v917_v29  ;;  %v918_v35 = vmul.f32 %v2044_v48, %v699_v33  ;;  %v1364_v63 = vadd.f32 %v2038_v46, %v1325_v43  ;;  %v1326_v0 = vmul.f32 %v2032_v44, %v1218_v25 }
  0xfb   : > { %v1394_v37 = vadd.f32 %v1362_v21, %v958_v31  ;;  %v959_v38 = vadd.f32 %v2049_v52, %v920_v32  ;;  %v1367_v8 = vadd.f32 %v2038_v46, %v1328_v58 }
  0xfc   : > { %v1392_v41 = vadd.f32 %v1360_v27, %v956_v34  ;;  %v957_v42 = vadd.f32 %v2049_v52, %v918_v35  ;;  %v1365_v12 = vadd.f32 %v2038_v46, %v1326_v0 }
  0xfd   : > { %v1426_v47 = vmax.f32 %v1394_v37, 0.0  ;;  %v1395_v49 = vadd.f32 %v1363_v36, %v959_v38 }
  0xfe   : > { %v1762_v45 = vpop.f32.mrb[12].mxu1  ;;  %v1424_v51 = vmax.f32 %v1392_v41, 0.0  ;;  %v1393_v53 = vadd.f32 %v1361_v40, %v957_v42  ;;  %v1724_v54 = vpop.f32.mrb[8].mxu0 }
  0xff   : > { %v1231_v50 = vpop.f32.mrb[13].mxu1  ;;  %1458 = vst [vmem:[%s2068_s13 + $0x30] sm:$0xff] %v1426_v47  ;;  %v1427_v56 = vmax.f32 %v1395_v49, 0.0  ;;  %v923_v59 = vmul.f32 %v1724_v54, %v2044_v48  ;;  %v712_v60 = vpop.f32.mrb[9].mxu0  ;;  %v1331_v11 = vmul.f32 %v1762_v45, %v2032_v44 }
 0x100   : > { %v1763_v55 = vpop.f32.mrb[14].mxu1  ;;  %1456 = vst [vmem:[%s2068_s13 + $0x20] sm:$0xff] %v1424_v51  ;;  %v1425_v62 = vmax.f32 %v1393_v53, 0.0  ;;  %v921_v1 = vmul.f32 %v2044_v48, %v712_v60  ;;  %v1725_v2 = vpop.f32.mrb[10].mxu0  ;;  %v1329_v15 = vmul.f32 %v2032_v44, %v1231_v50 }
 0x101   : > { %v1234_v61 = vpop.f32.mrb[15].mxu1  ;;  %1459 = vst [vmem:[%s2068_s13 + $0x38] sm:$0xff] %v1427_v56  ;;  %v962_v3 = vadd.f32 %v2049_v52, %v923_v59  ;;  %v924_v4 = vmul.f32 %v1725_v2, %v2044_v48  ;;  %v715_v5 = vpop.f32.mrb[11].mxu0  ;;  %v1370_v25 = vadd.f32 %v2038_v46, %v1331_v11  ;;  %v1332_v26 = vmul.f32 %v1763_v55, %v2032_v44 }
 0x102   : > { %1457 = vst [vmem:[%s2068_s13 + $0x28] sm:$0xff] %v1425_v62  ;;  %v960_v6 = vadd.f32 %v2049_v52, %v921_v1  ;;  %v922_v7 = vmul.f32 %v2044_v48, %v715_v5  ;;  %v1368_v31 = vadd.f32 %v2038_v46, %v1329_v15  ;;  %v1330_v32 = vmul.f32 %v2032_v44, %v1234_v61 }
 0x103   : > { %v1398_v9 = vadd.f32 %v1366_v57, %v962_v3  ;;  %v963_v10 = vadd.f32 %v2049_v52, %v924_v4  ;;  %v1371_v40 = vadd.f32 %v2038_v46, %v1332_v26 }
 0x104   : > { %v1396_v13 = vadd.f32 %v1364_v63, %v960_v6  ;;  %v961_v14 = vadd.f32 %v2049_v52, %v922_v7  ;;  %v1369_v45 = vadd.f32 %v2038_v46, %v1330_v32 }
 0x105   : > { %v1430_v17 = vmax.f32 %v1398_v9, 0.0  ;;  %v1399_v18 = vadd.f32 %v1367_v8, %v963_v10 }
 0x106   : > { %v1766_v16 = vpop.f32.mrb[16].mxu1  ;;  %v1428_v20 = vmax.f32 %v1396_v13, 0.0  ;;  %v1397_v21 = vadd.f32 %v1365_v12, %v961_v14  ;;  %v1728_v22 = vpop.f32.mrb[12].mxu0 }
 0x107   : > { %v1247_v19 = vpop.f32.mrb[17].mxu1  ;;  %1462 = vst [vmem:[%s2068_s13 + $0x50] sm:$0xff] %v1430_v17  ;;  %v1431_v24 = vmax.f32 %v1399_v18, 0.0  ;;  %v927_v27 = vmul.f32 %v1728_v22, %v2044_v48  ;;  %v728_v28 = vpop.f32.mrb[13].mxu0  ;;  %v1335_v43 = vmul.f32 %v1766_v16, %v2032_v44 }
 0x108   : > { %v1767_v23 = vpop.f32.mrb[18].mxu1  ;;  %1460 = vst [vmem:[%s2068_s13 + $0x40] sm:$0xff] %v1428_v20  ;;  %v1429_v30 = vmax.f32 %v1397_v21, 0.0  ;;  %v925_v33 = vmul.f32 %v2044_v48, %v728_v28  ;;  %v1729_v34 = vpop.f32.mrb[14].mxu0  ;;  %v1333_v50 = vmul.f32 %v2032_v44, %v1247_v19 }
 0x109   : > { %v1250_v29 = vpop.f32.mrb[19].mxu1  ;;  %1463 = vst [vmem:[%s2068_s13 + $0x58] sm:$0xff] %v1431_v24  ;;  %v966_v35 = vadd.f32 %v2049_v52, %v927_v27  ;;  %v928_v36 = vmul.f32 %v1729_v34, %v2044_v48  ;;  %v731_v37 = vpop.f32.mrb[15].mxu0  ;;  %v1374_v61 = vadd.f32 %v2038_v46, %v1335_v43  ;;  %v1336_v62 = vmul.f32 %v1767_v23, %v2032_v44 }
 0x10a   : > { %1461 = vst [vmem:[%s2068_s13 + $0x48] sm:$0xff] %v1429_v30  ;;  %v964_v38 = vadd.f32 %v2049_v52, %v925_v33  ;;  %v926_v39 = vmul.f32 %v2044_v48, %v731_v37  ;;  %v1372_v3 = vadd.f32 %v2038_v46, %v1333_v50  ;;  %v1334_v4 = vmul.f32 %v2032_v44, %v1250_v29 }
 0x10b   : > { %v1402_v41 = vadd.f32 %v1370_v25, %v966_v35  ;;  %v967_v42 = vadd.f32 %v2049_v52, %v928_v36  ;;  %v1375_v12 = vadd.f32 %v2038_v46, %v1336_v62 }
 0x10c   : > { %v1400_v47 = vadd.f32 %v1368_v31, %v964_v38  ;;  %v965_v49 = vadd.f32 %v2049_v52, %v926_v39  ;;  %v1373_v16 = vadd.f32 %v2038_v46, %v1334_v4 }
 0x10d   : > { %v1434_v53 = vmax.f32 %v1402_v41, 0.0  ;;  %v1403_v54 = vadd.f32 %v1371_v40, %v967_v42 }
 0x10e   : > { %v1770_v51 = vpop.f32.mrb[20].mxu1  ;;  %v1432_v56 = vmax.f32 %v1400_v47, 0.0  ;;  %v1401_v57 = vadd.f32 %v1369_v45, %v965_v49  ;;  %v1732_v58 = vpop.f32.mrb[16].mxu0 }
 0x10f   : > { %v1263_v55 = vpop.f32.mrb[21].mxu1  ;;  %1466 = vst [vmem:[%s2068_s13 + $0x70] sm:$0xff] %v1434_v53  ;;  %v1435_v60 = vmax.f32 %v1403_v54, 0.0  ;;  %v931_v63 = vmul.f32 %v1732_v58, %v2044_v48  ;;  %v744_v0 = vpop.f32.mrb[17].mxu0  ;;  %v1339_v15 = vmul.f32 %v1770_v51, %v2032_v44 }
 0x110   : > { %v1771_v59 = vpop.f32.mrb[22].mxu1  ;;  %1464 = vst [vmem:[%s2068_s13 + $0x60] sm:$0xff] %v1432_v56  ;;  %v1433_v2 = vmax.f32 %v1401_v57, 0.0  ;;  %v929_v5 = vmul.f32 %v2044_v48, %v744_v0  ;;  %v1733_v6 = vpop.f32.mrb[18].mxu0  ;;  %v1337_v19 = vmul.f32 %v2032_v44, %v1263_v55 }
 0x111   : > { %v1266_v1 = vpop.f32.mrb[23].mxu1  ;;  %1467 = vst [vmem:[%s2068_s13 + $0x78] sm:$0xff] %v1435_v60  ;;  %v970_v7 = vadd.f32 %v2049_v52, %v931_v63  ;;  %v932_v8 = vmul.f32 %v1733_v6, %v2044_v48  ;;  %v747_v9 = vpop.f32.mrb[19].mxu0  ;;  %v1378_v29 = vadd.f32 %v2038_v46, %v1339_v15  ;;  %v1340_v30 = vmul.f32 %v1771_v59, %v2032_v44 }
 0x112   : > { %1465 = vst [vmem:[%s2068_s13 + $0x68] sm:$0xff] %v1433_v2  ;;  %v968_v10 = vadd.f32 %v2049_v52, %v929_v5  ;;  %v930_v11 = vmul.f32 %v2044_v48, %v747_v9  ;;  %v1376_v35 = vadd.f32 %v2038_v46, %v1337_v19  ;;  %v1338_v36 = vmul.f32 %v2032_v44, %v1266_v1 }
 0x113   : > { %v1406_v13 = vadd.f32 %v1374_v61, %v970_v7  ;;  %v971_v14 = vadd.f32 %v2049_v52, %v932_v8  ;;  %v1379_v45 = vadd.f32 %v2038_v46, %v1340_v30 }
 0x114   : > { %v1404_v17 = vadd.f32 %v1372_v3, %v968_v10  ;;  %v969_v18 = vadd.f32 %v2049_v52, %v930_v11  ;;  %v1377_v51 = vadd.f32 %v2038_v46, %v1338_v36 }
 0x115   : > { %v1438_v21 = vmax.f32 %v1406_v13, 0.0  ;;  %v1407_v22 = vadd.f32 %v1375_v12, %v971_v14 }
 0x116   : > { %v1774_v20 = vpop.f32.mrb[24].mxu1  ;;  %v1436_v24 = vmax.f32 %v1404_v17, 0.0  ;;  %v1405_v25 = vadd.f32 %v1373_v16, %v969_v18  ;;  %v1736_v26 = vpop.f32.mrb[20].mxu0 }
 0x117   : > { %v1279_v23 = vpop.f32.mrb[25].mxu1  ;;  %1470 = vst [vmem:[%s2068_s13 + $0x90] sm:$0xff] %v1438_v21  ;;  %v1439_v28 = vmax.f32 %v1407_v22, 0.0  ;;  %v935_v31 = vmul.f32 %v1736_v26, %v2044_v48  ;;  %v760_v32 = vpop.f32.mrb[21].mxu0  ;;  %v1343_v50 = vmul.f32 %v1774_v20, %v2032_v44 }
 0x118   : > { %v1775_v27 = vpop.f32.mrb[26].mxu1  ;;  %1468 = vst [vmem:[%s2068_s13 + $0x80] sm:$0xff] %v1436_v24  ;;  %v1437_v34 = vmax.f32 %v1405_v25, 0.0  ;;  %v933_v37 = vmul.f32 %v2044_v48, %v760_v32  ;;  %v1737_v38 = vpop.f32.mrb[22].mxu0  ;;  %v1341_v55 = vmul.f32 %v2032_v44, %v1279_v23 }
 0x119   : > { %v1282_v33 = vpop.f32.mrb[27].mxu1  ;;  %1471 = vst [vmem:[%s2068_s13 + $0x98] sm:$0xff] %v1439_v28  ;;  %v974_v39 = vadd.f32 %v2049_v52, %v935_v31  ;;  %v936_v40 = vmul.f32 %v1737_v38, %v2044_v48  ;;  %v763_v41 = vpop.f32.mrb[23].mxu0  ;;  %v1382_v1 = vadd.f32 %v2038_v46, %v1343_v50  ;;  %v1344_v2 = vmul.f32 %v1775_v27, %v2032_v44 }
 0x11a   : > { %1469 = vst [vmem:[%s2068_s13 + $0x88] sm:$0xff] %v1437_v34  ;;  %v972_v42 = vadd.f32 %v2049_v52, %v933_v37  ;;  %v934_v43 = vmul.f32 %v2044_v48, %v763_v41  ;;  %v1380_v7 = vadd.f32 %v2038_v46, %v1341_v55  ;;  %v1342_v8 = vmul.f32 %v2032_v44, %v1282_v33 }
 0x11b   : > { %v1410_v47 = vadd.f32 %v1378_v29, %v974_v39  ;;  %v975_v49 = vadd.f32 %v2049_v52, %v936_v40  ;;  %v1383_v16 = vadd.f32 %v2038_v46, %v1344_v2 }
 0x11c   : > { %v1408_v53 = vadd.f32 %v1376_v35, %v972_v42  ;;  %v973_v54 = vadd.f32 %v2049_v52, %v934_v43  ;;  %v1381_v20 = vadd.f32 %v2038_v46, %v1342_v8 }
 0x11d   : > { %v1442_v57 = vmax.f32 %v1410_v47, 0.0  ;;  %v1411_v58 = vadd.f32 %v1379_v45, %v975_v49 }
 0x11e   : > { %v1778_v56 = vpop.f32.mrb[28].mxu1  ;;  %v1440_v60 = vmax.f32 %v1408_v53, 0.0  ;;  %v1409_v61 = vadd.f32 %v1377_v51, %v973_v54  ;;  %v1740_v62 = vpop.f32.mrb[24].mxu0 }
 0x11f   : > { %v1295_v59 = vpop.f32.mrb[29].mxu1  ;;  %1474 = vst [vmem:[%s2068_s13 + $0xb0] sm:$0xff] %v1442_v57  ;;  %v1443_v0 = vmax.f32 %v1411_v58, 0.0  ;;  %v939_v3 = vmul.f32 %v1740_v62, %v2044_v48  ;;  %v776_v4 = vpop.f32.mrb[25].mxu0  ;;  %v1347_v19 = vmul.f32 %v1778_v56, %v2032_v44 }
 0x120   : > { %v1779_v63 = vpop.f32.mrb[30].mxu1  ;;  %1472 = vst [vmem:[%s2068_s13 + $0xa0] sm:$0xff] %v1440_v60  ;;  %v1441_v6 = vmax.f32 %v1409_v61, 0.0  ;;  %v937_v9 = vmul.f32 %v2044_v48, %v776_v4  ;;  %v1741_v10 = vpop.f32.mrb[26].mxu0  ;;  %v1345_v23 = vmul.f32 %v2032_v44, %v1295_v59 }
 0x121   : > { %v1298_v5 = vpop.f32.mrb[31].mxu1  ;;  %1475 = vst [vmem:[%s2068_s13 + $0xb8] sm:$0xff] %v1443_v0  ;;  %v978_v11 = vadd.f32 %v2049_v52, %v939_v3  ;;  %v940_v12 = vmul.f32 %v1741_v10, %v2044_v48  ;;  %v779_v13 = vpop.f32.mrb[27].mxu0  ;;  %v1386_v30 = vadd.f32 %v2038_v46, %v1347_v19  ;;  %v1348_v31 = vmul.f32 %v1779_v63, %v2032_v44 }
 0x122   : > { %1473 = vst [vmem:[%s2068_s13 + $0xa8] sm:$0xff] %v1441_v6  ;;  %v976_v14 = vadd.f32 %v2049_v52, %v937_v9  ;;  %v938_v15 = vmul.f32 %v2044_v48, %v779_v13  ;;  %v1384_v35 = vadd.f32 %v2038_v46, %v1345_v23  ;;  %v1346_v36 = vmul.f32 %v2032_v44, %v1298_v5 }
 0x123   : > { %v1414_v17 = vadd.f32 %v1382_v1, %v978_v11  ;;  %v979_v18 = vadd.f32 %v2049_v52, %v940_v12  ;;  %v1387_v44 = vadd.f32 %v2038_v46, %v1348_v31 }
 0x124   : > { %v1412_v21 = vadd.f32 %v1380_v7, %v976_v14  ;;  %v977_v22 = vadd.f32 %v2049_v52, %v938_v15  ;;  %v1385_v49 = vadd.f32 %v2038_v46, %v1346_v36 }
 0x125   : > { %v1446_v24 = vmax.f32 %v1414_v17, 0.0  ;;  %v1415_v25 = vadd.f32 %v1383_v16, %v979_v18 }
 0x126   : > { %v1444_v26 = vmax.f32 %v1412_v21, 0.0  ;;  %v1413_v27 = vadd.f32 %v1381_v20, %v977_v22  ;;  %v1744_v28 = vpop.f32.mrb[28].mxu0 }
 0x127   : > { %1478 = vst [vmem:[%s2068_s13 + $0xd0] sm:$0xff] %v1446_v24  ;;  %v1447_v29 = vmax.f32 %v1415_v25, 0.0  ;;  %v943_v32 = vmul.f32 %v1744_v28, %v2044_v48  ;;  %v792_v33 = vpop.f32.mrb[29].mxu0 }
 0x128   : > { %1476 = vst [vmem:[%s2068_s13 + $0xc0] sm:$0xff] %v1444_v26  ;;  %v1445_v34 = vmax.f32 %v1413_v27, 0.0  ;;  %v941_v37 = vmul.f32 %v2044_v48, %v792_v33  ;;  %v1745_v38 = vpop.f32.mrb[30].mxu0 }
 0x129   : > { %1479 = vst [vmem:[%s2068_s13 + $0xd8] sm:$0xff] %v1447_v29  ;;  %v982_v39 = vadd.f32 %v2049_v52, %v943_v32  ;;  %v944_v40 = vmul.f32 %v1745_v38, %v2044_v48  ;;  %v795_v41 = vpop.f32.mrb[31].mxu0 }
 0x12a   : > { %1477 = vst [vmem:[%s2068_s13 + $0xc8] sm:$0xff] %v1445_v34  ;;  %v980_v42 = vadd.f32 %v2049_v52, %v941_v37  ;;  %v942_v43 = vmul.f32 %v2044_v48, %v795_v41 }
 0x12b   : > { %v1418_v45 = vadd.f32 %v1386_v30, %v982_v39  ;;  %v983_v47 = vadd.f32 %v2049_v52, %v944_v40 }
 0x12c   : > { %v1416_v50 = vadd.f32 %v1384_v35, %v980_v42  ;;  %v981_v51 = vadd.f32 %v2049_v52, %v942_v43 }
 0x12d   : > { %v1450_v53 = vmax.f32 %v1418_v45, 0.0  ;;  %v1419_v54 = vadd.f32 %v1387_v44, %v983_v47 }
 0x12e   : > { %v1448_v55 = vmax.f32 %v1416_v50, 0.0  ;;  %v1417_v56 = vadd.f32 %v1385_v49, %v981_v51 }
 0x12f   : > { %1482 = vst [vmem:[%s2068_s13 + $0xf0] sm:$0xff] %v1450_v53  ;;  %v1451_v57 = vmax.f32 %v1419_v54, 0.0 }
 0x130   : > { %1480 = vst [vmem:[%s2068_s13 + $0xe0] sm:$0xff] %v1448_v55  ;;  %v1449_v58 = vmax.f32 %v1417_v56, 0.0 }
 0x131   : > { %1483 = vst [vmem:[%s2068_s13 + $0xf8] sm:$0xff] %v1451_v57 }
 0x132   : > { %1481 = vst [vmem:[%s2068_s13 + $0xe8] sm:$0xff] %v1449_v58 }
 0x133 PF: > { %s18_s29 = sadd.s32 1, %s1865_s29   ;;  %s2233_s27 = smov %s1861_s28 }
 0x134   : > { %p15_p5 = scmp.ge.s32.totalorder %s18_s29, 4   ;;  %s2234_s28 = smov %s2236_s30 }
 0x136   :  { %17 = sbr.rel (!%p15_p5) target bundleno = 2 (0x2), region = 96 }

</bundles_post_ra>
